<compile_context>
chip_gen: v7x
topology: tpu7x:2x2x1
jax: 0.10.0
libtpu: 0.0.40
codegen_flags: <defaults>
</compile_context>

<pallas_src>
import functools

import jax
import jax.numpy as jnp
from jax.experimental import pallas as pl
from jax.experimental.pallas import tpu as pltpu


def _round_up(x: int, m: int) -> int:
    return ((x + m - 1) // m) * m


def _sublane_tile(dtype) -> int:
    # 32-bit -> 8, 16-bit -> 16, 8-bit -> 32 (sub-32-bit dtypes pack sublanes).
    itemsize = jnp.dtype(dtype).itemsize
    return 8 * max(1, 4 // itemsize)


def _vmem_capacity_bytes() -> int:
    try:
        return int(pltpu.get_tpu_info().vmem_capacity_bytes)
    except Exception:
        return 64 * 1024 * 1024  # conservative fallback: v7x per-TensorCore VMEM


def _zoom_out_kernel(off_ref, x_ref, o_ref, band_ref, *, fill):
    """Pad TB image planes into a fill-valued canvas at runtime offset (top, left).

    off_ref : SMEM (2,) int32 scalar-prefetch = [top, left]
    x_ref   : (TB, H,  W )      source planes (VMEM)
    o_ref   : (TB, Hc, Wc)      destination canvas planes (VMEM), true canvas dims
    band_ref: (TB, H,  Wp)      staging buffer, Wp = round_up(Wc, 128)
    """
    TB, H, W = x_ref.shape
    Wc = o_ref.shape[-1]          # true canvas width
    Wp = band_ref.shape[-1]       # lane-padded canvas width (multiple of 128)
    dt = o_ref.dtype
    top = off_ref[0]
    left = off_ref[1]

    # (1) Constant-fill the whole canvas block: full-lane-width stores; only the
    #     inherent ragged right/bottom edge vregs of the true canvas are masked.
    o_ref[...] = jnp.full(o_ref.shape, fill, dtype=dt)

    # (2) Stage the H source rows at lane-padded canvas width with the image at
    #     column 0 (static slices only), then rotate lanes by the runtime
    #     `left` offset.  The rotate runs on the XLU (its own issue slot); the
    #     columns that wrap around are fill values, so no extra masking needed.
    if Wp > W:
        band_ref[:, :, W:] = jnp.full((TB, H, Wp - W), fill, dtype=dt)
    band_ref[:, :, :W] = x_ref[...]
    band = band_ref[...]
    if Wc > W:                    # canvas_w == W implies left == 0: skip rotate
        band = pltpu.roll(band, left, axis=2)

    # (3) Drop the source band at the runtime row offset `top`: full lane
    #     width, dynamic offset only on the sublane (2nd-minor) dimension.
    o_ref[:, pl.ds(top, H), :] = band[:, :, :Wc]


def _pad_with_pallas(x, top, left, canvas_h, canvas_w, fill):
    """x: (N, C, H, W) -> (N, C, canvas_h, canvas_w), constant-fill padding."""
    N, C, H, W = x.shape
    NC = N * C
    dt = x.dtype
    itemsize = jnp.dtype(dt).itemsize
    x_flat = x.reshape(NC, H, W)

    # Keep fill in the native dtype domain (integer images truncate like a
    # plain cast).  TODO(synk): per-channel / per-type fill dicts
    # (_setup_fill_arg) and the pytree/PIL dispatch of Transform.forward are
    # not supported; scalar fill on a single NCHW tensor only.
    fill = jnp.dtype(dt).type(fill)

    sub = _sublane_tile(dt)
    wp = _round_up(canvas_w, 128)          # lane-padded staging width (scratch)

    # ---- Block sizing (VMEM footprints use lane/sublane-padded shapes) ----
    in_plane = _round_up(H, sub) * _round_up(W, 128) * itemsize
    out_plane = _round_up(canvas_h, sub) * wp * itemsize
    band_plane = _round_up(H, sub) * wp * itemsize
    per_plane = in_plane + out_plane

    cap = _vmem_capacity_bytes()
    budget = cap // 4                       # live in+out pair ~25% of VMEM so
                                            # double-buffering stays under ~50%
    max_tb = min(NC, max(1, budget // per_plane))
    steps = pl.cdiv(NC, max_tb)
    # v7x megacore: prefer >=2 and even grid steps so both TensorCores get
    # balanced work (harmless on single-core v5e/v6e: one extra ~0.35us step).
    if NC >= 2 and steps % 2 == 1:
        steps = min(NC, steps + 1)
    tb = pl.cdiv(NC, steps)
    steps = pl.cdiv(NC, tb)                 # actual grid (ragged last block OK)

    block_bytes = tb * per_plane
    scratch_bytes = tb * band_plane
    need = 2 * block_bytes + scratch_bytes + (1 << 20)
    # Cap at ~85% of physical VMEM (headroom for Mosaic internal scratch /
    # semaphores -- matters on v7x's 64 MiB); no artificial 64 MiB cap on
    # v5e/v6e's 128 MiB parts.
    vmem_limit = max(32 * 1024 * 1024, min(int(0.85 * cap), int(1.25 * need)))
    # TODO(synk): row-tile the canvas (second grid axis over sublane-multiple
    # row blocks) when a single plane exceeds the budget (e.g. 4K float
    # canvases on v7x), instead of relying on the VMEM limit alone.

    # Runtime padding offsets go to SMEM via scalar prefetch: a given
    # (input shape, canvas shape, dtype) compiles exactly once regardless of
    # the sampled (top, left).  The canvas shape itself must stay static (it
    # is the output shape), so distinct sampled ratios still compile separately.
    offsets = jnp.asarray([int(top), int(left)], dtype=jnp.int32)

    kernel = functools.partial(_zoom_out_kernel, fill=fill)

    out_flat = pl.pallas_call(
        kernel,
        # True canvas shape: no rounding, no wrapper crop (a crop would re-read
        # and re-write the entire canvas as a separate XLA op).
        out_shape=jax.ShapeDtypeStruct((NC, canvas_h, canvas_w), dt),
        grid_spec=pltpu.PrefetchScalarGridSpec(
            num_scalar_prefetch=1,
            grid=(steps,),
            # NOTE: W < 128 lane-pads the input DMA/VMEM buffer (read
            # amplification on thumbnail inputs); accepted -- the canvas write
            # dominates HBM traffic.
            in_specs=[pl.BlockSpec((tb, H, W), lambda i, off: (i, 0, 0))],
            out_specs=pl.BlockSpec((tb, canvas_h, canvas_w),
                                   lambda i, off: (i, 0, 0)),
            scratch_shapes=[pltpu.VMEM((tb, H, wp), dt)],
        ),
        compiler_params=pltpu.CompilerParams(
            dimension_semantics=("parallel",),
            vmem_limit_bytes=int(vmem_limit),
        ),
    )(offsets, x_flat)

    return out_flat.reshape(N, C, canvas_h, canvas_w)


def _get_params(key, orig_h, orig_w, side_range):
    """Mirror of RandomZoomOut._get_params (trace time; shapes must be static)."""
    k_ratio, k_offs = jax.random.split(key)
    u = jax.device_get(jnp.concatenate([jax.random.uniform(k_ratio, (1,)),
                                        jax.random.uniform(k_offs, (2,))]))
    r = side_range[0] + float(u[0]) * (side_range[1] - side_range[0])
    canvas_w = int(orig_w * r)
    canvas_h = int(orig_h * r)
    left = int((canvas_w - orig_w) * float(u[1]))
    top = int((canvas_h - orig_h) * float(u[2]))
    return canvas_h, canvas_w, top, left


def random_zoom_out(x, key, *, fill=0.0, side_range=(1.0, 2.0), p=0.5):
    """JAX/Pallas equivalent of RandomZoomOut.forward for a single NCHW tensor.

    NOTE: the zoom ratio is sampled at trace time (host sync) because the
    output shape depends on it, so this function cannot be wrapped in jax.jit;
    the p-branch is likewise a Python branch.  (top, left) are runtime values
    and do NOT trigger recompilation.
    """
    if side_range[0] < 1.0 or side_range[0] > side_range[1]:
        raise ValueError(f"Invalid side range provided {side_range}.")

    k_apply, k_params = jax.random.split(key)

    # `if torch.rand(1) >= self.p: return inputs`
    if float(jax.random.uniform(k_apply)) >= p:
        return x

    N, C, orig_h, orig_w = x.shape
    canvas_h, canvas_w, top, left = _get_params(k_params, orig_h, orig_w,
                                                side_range)
    return _pad_with_pallas(x, top, left, canvas_h, canvas_w, fill)


def _reference_pad(x, top, left, canvas_h, canvas_w, fill):
    N, C, H, W = x.shape
    ref = jnp.full((N, C, canvas_h, canvas_w), fill, dtype=x.dtype)
    return ref.at[:, :, top:top + H, left:left + W].set(x)


if __name__ == "__main__":
    key = jax.random.PRNGKey(0)
    k_data, k_a, k_b, k_c = jax.random.split(key, 4)

    side_range = (1.0, 2.0)
    fill = 0.5

    # Main check: batch=2, channels=4, 16x16 spatial.
    x = jax.random.normal(k_data, (2, 4, 16, 16), dtype=jnp.float32)
    # Second input with N*C = 3 exercises the ragged (non-dividing) plane grid.
    x_odd = jax.random.normal(k_c, (1, 3, 16, 16), dtype=jnp.float32)

    for inp, k_rng in ((x, k_a), (x, k_b), (x_odd, k_a)):
        out = jax.block_until_ready(
            random_zoom_out(inp, k_rng, fill=fill, side_range=side_range, p=1.0))
        # Pure-JAX reference with the same sampled params.
        _, k_params = jax.random.split(k_rng)
        H, W = inp.shape[-2:]
        ch, cw, top, left = _get_params(k_params, H, W, side_range)
        ref = _reference_pad(inp, top, left, ch, cw, fill)
        assert out.shape == ref.shape, (out.shape, ref.shape)
        assert bool(jnp.array_equal(out, ref)), "mismatch vs reference"

    # p = 0 branch: identity passthrough.
    out_id = random_zoom_out(x, k_a, fill=fill, side_range=side_range, p=0.0)
    assert out_id is x

    print("KERNEL_OK")
</pallas_src>

<mosaic_0001>
module attributes {stable_mosaic.version = 11 : i64} {
  func.func @_zoom_out_kernel(%arg0: i32, %arg1: memref<2xi32, #tpu.memory_space<smem>>, %arg2: memref<4x16x16xf32, #tpu.memory_space<vmem>>, %arg3: memref<4x16x16xf32, #tpu.memory_space<vmem>>, %arg4: memref<4x16x128xf32, #tpu.memory_space<vmem>>) attributes {dimension_semantics = [#tpu.dimension_semantics<parallel>], iteration_bounds = array<i64: 2>, scalar_prefetch = 1 : i64, scratch_operands = 1 : i64, tpu.core_type = #tpu.core_type<tc>, window_params = [{transform_indices = @transform_0, window_bounds = array<i64: 4, 16, 16>}, {transform_indices = @transform_1, window_bounds = array<i64: 4, 16, 16>}]} {
    %c0 = arith.constant 0 : index
    %0 = memref.load %arg1[%c0] : memref<2xi32, #tpu.memory_space<smem>>
    %cst = arith.constant 5.000000e-01 : f32
    %1 = vector.broadcast %cst : f32 to vector<4x16x16xf32>
    %c0_0 = arith.constant 0 : index
    %c0_1 = arith.constant 0 : index
    %c0_2 = arith.constant 0 : index
    %2 = vector.load %arg3[%c0_0, %c0_1, %c0_2] : memref<4x16x16xf32, #tpu.memory_space<vmem>>, vector<4x16x16xf32>
    tpu.vector_store %arg3[%c0_0, %c0_1, %c0_2], %1 {strides = array<i32>} : memref<4x16x16xf32, #tpu.memory_space<vmem>>, vector<4x16x16xf32>,
    %cst_3 = arith.constant 5.000000e-01 : f32
    %3 = vector.broadcast %cst_3 : f32 to vector<4x16x112xf32>
    %c0_4 = arith.constant 0 : index
    %c0_5 = arith.constant 0 : index
    %c16 = arith.constant 16 : index
    %4 = vector.load %arg4[%c0_4, %c0_5, %c16] : memref<4x16x128xf32, #tpu.memory_space<vmem>>, vector<4x16x112xf32>
    tpu.vector_store %arg4[%c0_4, %c0_5, %c16], %3 {strides = array<i32>} : memref<4x16x128xf32, #tpu.memory_space<vmem>>, vector<4x16x112xf32>,
    %c0_6 = arith.constant 0 : index
    %c0_7 = arith.constant 0 : index
    %c0_8 = arith.constant 0 : index
    %5 = vector.load %arg2[%c0_6, %c0_7, %c0_8] : memref<4x16x16xf32, #tpu.memory_space<vmem>>, vector<4x16x16xf32>
    %c0_9 = arith.constant 0 : index
    %c0_10 = arith.constant 0 : index
    %c0_11 = arith.constant 0 : index
    %6 = vector.load %arg4[%c0_9, %c0_10, %c0_11] : memref<4x16x128xf32, #tpu.memory_space<vmem>>, vector<4x16x16xf32>
    tpu.vector_store %arg4[%c0_9, %c0_10, %c0_11], %5 {strides = array<i32>} : memref<4x16x128xf32, #tpu.memory_space<vmem>>, vector<4x16x16xf32>,
    %c0_12 = arith.constant 0 : index
    %c0_13 = arith.constant 0 : index
    %c0_14 = arith.constant 0 : index
    %7 = vector.load %arg4[%c0_12, %c0_13, %c0_14] : memref<4x16x128xf32, #tpu.memory_space<vmem>>, vector<4x16x128xf32>
    %8 = vector.extract_strided_slice %7 {offsets = [0, 0, 0], sizes = [4, 16, 16], strides = [1, 1, 1]} : vector<4x16x128xf32> to vector<4x16x16xf32>
    %c0_15 = arith.constant 0 : index
    %9 = arith.index_cast %0 : i32 to index
    %c0_16 = arith.constant 0 : index
    %10 = vector.load %arg3[%c0_15, %9, %c0_16] : memref<4x16x16xf32, #tpu.memory_space<vmem>>, vector<4x16x16xf32>
    tpu.vector_store %arg3[%c0_15, %9, %c0_16], %8 {strides = array<i32>} : memref<4x16x16xf32, #tpu.memory_space<vmem>>, vector<4x16x16xf32>,
    return
  }
  func.func @transform_0(%arg0: i32, %arg1: memref<2xi32, #tpu.memory_space<smem>>) -> (i32, i32, i32) {
    %c0_i32 = arith.constant 0 : i32
    %c0_i32_0 = arith.constant 0 : i32
    %c0_i32_1 = arith.constant 0 : i32
    return %arg0, %c0_i32, %c0_i32_0 : i32, i32, i32
  }
  func.func @transform_1(%arg0: i32, %arg1: memref<2xi32, #tpu.memory_space<smem>>) -> (i32, i32, i32) {
    %c0_i32 = arith.constant 0 : i32
    %c0_i32_0 = arith.constant 0 : i32
    %c0_i32_1 = arith.constant 0 : i32
    return %arg0, %c0_i32, %c0_i32_0 : i32, i32, i32
  }
}

</mosaic_0001>

<bundles_post_ra>
// kernel: tpu_custom_call.1
= control target key start
LH: loop header
LB: loop body
LE: loop exit
PB: predicated region body
PF: predicated region fallthrough
CT: control target
= control target key end

     0   :  { %s709_s0 = inlined_call_operand.hbm [shape: s32[2], index: 0, kind: input, shape index: {}]   ;;  %s710_s1 = inlined_call_operand.hbm [shape: f32[8,16,16], index: 1, kind: input, shape index: {}]   ;;  %s711_s2 = inlined_call_operand.hbm [shape: f32[8,16,16], index: 2, kind: output, shape index: {}]  }
   0x1   :  { %s356_s11 = scalar_lea.hbm %s709_s0, 16 }
   0x2   :  { %p357_p0 = scmp.ne.s32.totalorder %s709_s0, %s356_s11  ;;  %p360_p1 = scmp.lt.u32.totalorder %s356_s11, %s709_s0 }
   0x4   :  { %p362_p2 = pnand %p360_p1, %p357_p0 }
   0x6   :  { %365 = shalt.err (!%p362_p2)  }
   0x7   :  { %s466_s16 = smov [#allocation4]  }
   0x8   :  { %8 = dma.hbm_to_smem %s709_s0, 16, %s466_s16, [#allocation3] }
   0x9   :  { %440 = dma.done.wait [#allocation3], 16 }
   0xa   :  { %441 = vsyncadd [#allocation3], 4294967280 }
   0xb   :  { %10 = sfence }
   0xc   :  { %11 = vsyncpa [#allocation6], 0 }
   0xd   :  { %13 = vsyncpa [#allocation6 + $0x1], 0 }
   0xe   :  { %14 = vsyncpa [#allocation7], 0 }
   0xf   :  { %16 = vsyncpa [#allocation7 + $0x1], 0  ;;  %s501_s19 = smov 0   ;;  %s503_s20 = smov 0  }
  0x10   :  { %s505_s21 = smov 0   ;;  %s507_s22 = smov 0  }
  0x11 LB: > { %s522_s0 = sadd.s32 4294967295, %s464_s22   ;;  %s284_s23 = sadd.s32 4294967294, %s464_s22   ;;  %s464_s22 = sphi %s507_s22, %s724_s22   ;;  %s460_s21 = sphi %s505_s21, %s723_s21   ;;  %s456_s20 = sphi %s503_s20, %s722_s20   ;;  %s452_s19 = sphi %s501_s19, %s721_s19  }
  0x12   : > { %s526_s24 = sadd.s32 1, %s464_s22   ;;  %s29_s25 = sadd.s32 1, %s460_s21 }
  0x13   : > { %s26_s26 = ssub.s32 %s464_s22, %s526_s24  ;;  %p36_p3 = scmp.ne.s32.totalorder %s460_s21, %s456_s20 }
  0x14   : > { %p27_p4 = scmp.eq.s32.totalorder %s26_s26, 0  ;;  %p37_p5 = scmp.eq.s32.totalorder %s464_s22, 0 }
  0x15   : > { %p42_p6 = scmp.ne.s32.totalorder %s456_s20, %s452_s19  ;;  %p43_p7 = scmp.eq.s32.totalorder %s522_s0, 0 }
  0x16   : > { %s538_s27 = scalar_select %p27_p4, %s460_s21, %s29_s25  }
  0x17   : > { %p540_p8 = por %p37_p5, %p36_p3  ;;  %p544_p9 = por %p43_p7, %p42_p6 }
  0x18   : > { %p66_p10 = scmp.eq.s32.totalorder %s522_s0, 1  ;;  %p72_p11 = scmp.eq.s32.totalorder %s284_s23, 1 }
  0x19   : > { %p316_p13 = scmp.lt.s32.totalorder %s464_s22, 2  ;;  %s92_s4 = sand.u32 1, %s460_s21  }
  0x1a   : > { %p551_p0 = por %p66_p10, %p36_p3  ;;  %p555_p1 = por %p72_p11, %p42_p6 }
  0x1b   : > { %s301_s5 = sshll.u32 %s464_s22, 10  ;;  %s287_s6 = sshll.u32 %s92_s4, 6 }
  0x1c   : > { %s715_s30 = scalar_select %p551_p0, 1, 0 }
  0x1d   : > { %s716_s3 = scalar_select %p555_p1, 1, 0 }
  0x1e   : > { %s564_s9 = scalar_lea.hbm %s710_s1, %s301_s5  ;;  %s96_s10 = scalar_lea.vmem [#allocation5], %s287_s6 }
  0x1f   : > { %s104_s11 = sshll.u32 %s96_s10, 4  ;;  %p568_p2 = pnand %p316_p13, %p540_p8  ;;  %s572_s11 = int_to_ptr.vmem [resolvable:$true] %s104_s11 }
  0x20   : > { %s574_s13 = scalar_lea.sflag [#allocation6], %s92_s4  ;;  %s366_s14 = scalar_lea.hbm %s564_s9, 1024 }
  0x21   : > { %p367_p3 = scmp.ne.s32.totalorder %s564_s9, %s366_s14  ;;  %p368_p4 = pneg %p568_p2 }
  0x22   : > { %s371_s17 = scalar_lea.hbm %s710_s1, 2048  ;;  %p372_p7 = scmp.lt.u32.totalorder %s564_s9, %s710_s1 }
  0x23   : > { %p369_p5 = pnand %p368_p4, %p367_p3  ;;  %p373_p8 = scmp.lt.u32.totalorder %s371_s17, %s366_s14 }
  0x24   : > { %p375_p11 = scmp.lt.u32.totalorder %s366_s14, %s564_s9 }
  0x25   : > { %p370_p6 = pneg %p369_p5  ;;  %p374_p10 = por %p373_p8, %p372_p7 }
  0x27   : > { %p376_p13 = por %p375_p11, %p374_p10 }
  0x29   : > { %p377_p12 = pnand %p376_p13, %p370_p6 }
  0x2b   : > { %380 = shalt.err (!%p377_p12)
}
  0x2c   : > { %s381_s25 = scalar_lea.vmem %s572_s11, 1024  ;;  %s467_s26 = smov [#allocation5]  }
  0x2d   : > { %p382_p3 = scmp.ne.s32.totalorder %s572_s11, %s381_s25  ;;  %s386_s28 = sshll.u32 %s467_s26, 4  ;;  %s387_s28 = int_to_ptr.vmem [resolvable:$false] %s386_s28 }
  0x2e   : > { %s388_s4 = scalar_lea.vmem %s387_s28, 2048  ;;  %p389_p0 = scmp.lt.s32.totalorder %s572_s11, %s387_s28 }
  0x2f   : > { %p384_p5 = pnand %p382_p3, %p368_p4  ;;  %p390_p7 = scmp.lt.s32.totalorder %s388_s4, %s381_s25 }
  0x31   : > { %p385_p1 = pneg %p384_p5  ;;  %p391_p8 = por %p390_p7, %p389_p0 }
  0x33   : > { %p392_p10 = pnand %p391_p8, %p385_p1 }
  0x35   : > { %395 = shalt.err (!%p392_p10)
}
  0x36   : > { %s468_s5 = smov 128   ;;  %s469_s6 = smov 8  }
  0x37   : > { %311 = dma.hbm_to_vmem [thread:$0]  (!%p568_p2), %s564_s9, 1024, %s572_s11, %s574_s13, %s468_s5, %s468_s5, %s469_s6  }
  0x38   : > { %p291_p12 = scmp.ge.s32.totalorder %s464_s22, 1  ;;  %p112_p4 = scmp.lt.s32.totalorder %s464_s22, 3 }
  0x3a   : > { %p113_p6 = pnand %p291_p12, %p112_p4 }
  0x3b   : > { %s605_s7 = sand.u32 (!%p113_p6), 1, %s456_s20  }
  0x3c   : > { %116 = sbr.rel (%p113_p6) target bundleno = 103 (0x67), region = 24  ;;  %s292_s8 = sshll.u32 (!%p113_p6), %s605_s7, 6 }
  0x3d   : > { %s119_s10 = scalar_lea.sflag (!%p113_p6), [#allocation6], %s605_s7  ;;  %s609_s14 = scalar_lea.vmem (!%p113_p6), [#allocation5], %s292_s8 }
  0x43   : > { %443 = dma.done.wait (%p544_p9), %s119_s10, 1024  }
  0x44   : > { %445 = vsyncadd (%p544_p9), %s119_s10, 4294966272  ;;  %vm153_vm0 = vcmask 1047680   ;;  %vm144_vm1 = vcmask 130048   ;;  %v470_v0 = vmov 0.5   ;;  %s615_s9 = scalar_lea.vmem [#allocation8], %s292_s8  ;;  %s143_s29 = sld [smem:[#allocation4]] }
  0x45   : > { %154 = vst.msk [vmem:[#allocation2] sm:$0xff] %vm153_vm0, %v470_v0  ;;  %155 = vst.msk [vmem:[#allocation2 + $0x8] sm:$0xff] %vm153_vm0, %v470_v0  ;;  %v162_v1 = vld [vmem:[%s609_s14] sm:$0xff]  ;;  %v163_v2 = vld [vmem:[%s609_s14 + $0x8] sm:$0xff]  ;;  %s210_s11 = sshll.u32 %s615_s9, 4  ;;  %s303_s12 = sshll.u32 %s522_s0, 10  ;;  %s652_s11 = int_to_ptr.vmem [resolvable:$true] %s210_s11 }
  0x46   : > { %156 = vst.msk [vmem:[#allocation2 + $0x10] sm:$0xff] %vm153_vm0, %v470_v0  ;;  %157 = vst.msk [vmem:[#allocation2 + $0x18] sm:$0xff] %vm153_vm0, %v470_v0  ;;  %v164_v3 = vld [vmem:[%s609_s14 + $0x10] sm:$0xff]  ;;  %v165_v4 = vld [vmem:[%s609_s14 + $0x18] sm:$0xff]  ;;  %s657_s17 = scalar_lea.hbm %s711_s2, %s303_s12  ;;  %s196_s0 = scalar_lea.sflag [#allocation7], %s605_s7 }
  0x47   : > { %158 = vst.msk [vmem:[#allocation2 + $0x20] sm:$0xff] %vm153_vm0, %v470_v0  ;;  %159 = vst.msk [vmem:[#allocation2 + $0x28] sm:$0xff] %vm153_vm0, %v470_v0  ;;  %v166_v5 = vld [vmem:[%s609_s14 + $0x20] sm:$0xff]  ;;  %v167_v6 = vld [vmem:[%s609_s14 + $0x28] sm:$0xff]  ;;  %s396_s18 = scalar_lea.vmem %s652_s11, 1024  ;;  %p718_p0 = scmp.ne.s32.totalorder %s715_s30, 0 }
  0x48   : > { %160 = vst.msk [vmem:[#allocation2 + $0x30] sm:$0xff] %vm153_vm0, %v470_v0  ;;  %161 = vst.msk [vmem:[#allocation2 + $0x38] sm:$0xff] %vm153_vm0, %v470_v0  ;;  %v168_v7 = vld [vmem:[%s609_s14 + $0x30] sm:$0xff]  ;;  %v169_v8 = vld [vmem:[%s609_s14 + $0x38] sm:$0xff]  ;;  %p397_p9 = scmp.ne.s32.totalorder %s652_s11, %s396_s18  ;;  %s471_s23 = smov [#allocation8]  }
  0x49   : > { %145 = vst.msk [vmem:[%s615_s9] sm:$0xff] %vm144_vm1, %v470_v0  ;;  %146 = vst.msk [vmem:[%s615_s9 + $0x8] sm:$0xff] %vm144_vm1, %v470_v0  ;;  %s400_s25 = sshll.u32 %s471_s23, 4  ;;  %s401_s25 = int_to_ptr.vmem [resolvable:$false] %s400_s25 }
  0x4a   : > { %147 = vst.msk [vmem:[%s615_s9 + $0x10] sm:$0xff] %vm144_vm1, %v470_v0  ;;  %148 = vst.msk [vmem:[%s615_s9 + $0x18] sm:$0xff] %vm144_vm1, %v470_v0  ;;  %s186_s13 = scalar_lea.vmem %s615_s9, %s143_s29 [#allocation8]  ;;  %p398_p1 = pnand %p397_p9, %p718_p0 }
  0x4b   : > { %149 = vst.msk [vmem:[%s615_s9 + $0x20] sm:$0xff] %vm144_vm1, %v470_v0  ;;  %150 = vst.msk [vmem:[%s615_s9 + $0x28] sm:$0xff] %vm144_vm1, %v470_v0  ;;  %s402_s26 = scalar_lea.vmem %s401_s25, 2048  ;;  %p403_p11 = scmp.lt.s32.totalorder %s652_s11, %s401_s25 }
  0x4c   : > { %151 = vst.msk [vmem:[%s615_s9 + $0x30] sm:$0xff] %vm144_vm1, %v470_v0  ;;  %152 = vst.msk [vmem:[%s615_s9 + $0x38] sm:$0xff] %vm144_vm1, %v470_v0  ;;  %p399_p2 = pneg %p398_p1  ;;  %p404_p13 = scmp.lt.s32.totalorder %s402_s26, %s396_s18 }
  0x4d   : > { %170 = vst.msk [vmem:[#allocation2] sm:$0xff] %vm144_vm1, %v162_v1  ;;  %171 = vst.msk [vmem:[#allocation2 + $0x8] sm:$0xff] %vm144_vm1, %v163_v2 }
  0x4e   : > { %172 = vst.msk [vmem:[#allocation2 + $0x10] sm:$0xff] %vm144_vm1, %v164_v3  ;;  %173 = vst.msk [vmem:[#allocation2 + $0x18] sm:$0xff] %vm144_vm1, %v165_v4  ;;  %p405_p3 = por %p404_p13, %p403_p11 }
  0x4f   : > { %174 = vst.msk [vmem:[#allocation2 + $0x20] sm:$0xff] %vm144_vm1, %v166_v5  ;;  %175 = vst.msk [vmem:[#allocation2 + $0x28] sm:$0xff] %vm144_vm1, %v167_v6 }
  0x50   : > { %176 = vst.msk [vmem:[#allocation2 + $0x30] sm:$0xff] %vm144_vm1, %v168_v7  ;;  %177 = vst.msk [vmem:[#allocation2 + $0x38] sm:$0xff] %vm144_vm1, %v169_v8  ;;  %p406_p5 = pnand %p405_p3, %p399_p2 }
  0x54   : > { %v178_v9 = vld [vmem:[#allocation2] sm:$0xff]  ;;  %v179_v10 = vld [vmem:[#allocation2 + $0x8] sm:$0xff] }
  0x55   : > { %v180_v11 = vld [vmem:[#allocation2 + $0x10] sm:$0xff]  ;;  %v181_v12 = vld [vmem:[#allocation2 + $0x18] sm:$0xff]  ;;  %187 = vst.msk [vmem:[%s186_s13] sm:$0xff] %vm144_vm1, %v178_v9  ;;  %188 = vst.msk [vmem:[%s186_s13 + $0x8] sm:$0xff] %vm144_vm1, %v179_v10 }
  0x56   : > { %v182_v13 = vld [vmem:[#allocation2 + $0x20] sm:$0xff]  ;;  %v183_v14 = vld [vmem:[#allocation2 + $0x28] sm:$0xff]  ;;  %189 = vst.msk [vmem:[%s186_s13 + $0x10] sm:$0xff] %vm144_vm1, %v180_v11  ;;  %190 = vst.msk [vmem:[%s186_s13 + $0x18] sm:$0xff] %vm144_vm1, %v181_v12 }
  0x57   : > { %v184_v15 = vld [vmem:[#allocation2 + $0x30] sm:$0xff]  ;;  %v185_v16 = vld [vmem:[#allocation2 + $0x38] sm:$0xff]  ;;  %191 = vst.msk [vmem:[%s186_s13 + $0x20] sm:$0xff] %vm144_vm1, %v182_v13  ;;  %192 = vst.msk [vmem:[%s186_s13 + $0x28] sm:$0xff] %vm144_vm1, %v183_v14 }
  0x58   : > { %193 = vst.msk [vmem:[%s186_s13 + $0x30] sm:$0xff] %vm144_vm1, %v184_v15  ;;  %194 = vst.msk [vmem:[%s186_s13 + $0x38] sm:$0xff] %vm144_vm1, %v185_v16 }
  0x59   : > { %409 = shalt.err (!%p406_p5)
}
  0x5a   : > { %s410_s28 = scalar_lea.hbm %s657_s17, 1024  ;;  %s414_s6 = scalar_lea.hbm %s711_s2, 2048 }
  0x5b   : > { %p411_p7 = scmp.ne.s32.totalorder %s657_s17, %s410_s28  ;;  %p415_p12 = scmp.lt.u32.totalorder %s657_s17, %s711_s2 }
  0x5c   : > { %p416_p4 = scmp.lt.u32.totalorder %s414_s6, %s410_s28  ;;  %p418_p9 = scmp.lt.u32.totalorder %s410_s28, %s657_s17 }
  0x5d   : > { %p412_p8 = pnand %p411_p7, %p718_p0 }
  0x5e   : > { %p417_p6 = por %p416_p4, %p415_p12 }
  0x5f   : > { %p413_p10 = pneg %p412_p8 }
  0x60   : > { %p419_p1 = por %p418_p9, %p417_p6 }
  0x62   : > { %p420_p2 = pnand %p419_p1, %p413_p10 }
  0x64   : > { %423 = shalt.err (!%p420_p2)
}
  0x65   : > { %s472_s14 = smov 128   ;;  %s473_s9 = smov 8  }
  0x66   : > { %306 = dma.vmem_to_hbm [thread:$0]  (%p718_p0), %s652_s11, 1024, %s657_s17, %s196_s0, %s472_s14, %s472_s14, %s473_s9  }
  0x67 PF: > { %s225_s29 = sand.u32 1, %s452_s19   ;;  %p719_p11 = scmp.ne.s32.totalorder %s716_s3, 0 }
  0x68   : > { %p720_p13 = scmp.ge.s32.totalorder %s464_s22, 2  ;;  %s226_s12 = scalar_lea.sflag [#allocation7], %s225_s29 }
  0x6a   : > { %p313_p3 = pnand %p720_p13, %p719_p11 }
  0x6c   : > { %447 = dma.done.wait (!%p313_p3), %s226_s12, 1024  }
  0x6d   : > { %449 = vsyncadd (!%p313_p3), %s226_s12, 4294966272  ;;  %p19_p5 = scmp.ge.s32.totalorder %s526_s24, 4   ;;  %s721_s19 = smov %s456_s20 }
  0x6e   : > { %s722_s20 = smov %s460_s21  ;;  %s723_s21 = smov %s538_s27 }
  0x6f   : > { %s724_s22 = smov %s526_s24  ;;  %21 = sbr.rel (!%p19_p5) target bundleno = 17 (0x11), region = 70 }
  0x76   :  { %231 = vsyncpa [#allocation6], 1 }
  0x77   :  { %233 = vsyncpa [#allocation6 + $0x1], 1 }
  0x78   :  { %234 = vsyncpa [#allocation7], 1 }
  0x79   :  { %236 = vsyncpa [#allocation7 + $0x1], 1 }

</bundles_post_ra>
